<compile_context>
chip_gen: v7x
topology: tpu7x:2x2x1
jax: 0.10.0
libtpu: 0.0.40
codegen_flags: <defaults>
</compile_context>

<pallas_src>
import functools

import jax
import jax.numpy as jnp
from jax import lax
from jax.experimental import pallas as pl
from jax.experimental.pallas import tpu as pltpu

K_VALUE = 2  # num_selected_experts (top-k)


def _round_up(x, m):
    return (x + m - 1) // m * m


def _pick_tile(T, limit):
    """Largest candidate tile that divides T and is <= limit (fallback: T)."""
    for t in (512, 256, 128, 64, 32, 16, 8):
        if t <= limit and T % t == 0:
            return t
    # TODO(synk): ragged T (prime / not divisible by 8) falls back to one tile.
    return T


def _vmem_limit(est_bytes):
    return int(min(64 << 20, max(32 << 20, est_bytes)))


# --------------------------------------------------------------------------
# Kernel A: top-k selection + within-choice global rank (sequential over
# token tiles via a carried per-choice per-expert count).
# --------------------------------------------------------------------------
def _select_kernel(probs_ref, idx_ref, gate_ref, rank_ref, totals_ref, carry_ref, *, k):
    @pl.when(pl.program_id(1) == 0)
    def _():
        carry_ref[...] = jnp.zeros_like(carry_ref)

    p = probs_ref[0].astype(jnp.float32)            # [tT, E]  (cast in-kernel)
    tT, E = p.shape

    eiota = lax.broadcasted_iota(jnp.int32, (tT, E), 1)

    # ---- top-k selection (VPU only) -------------------------------------
    work = p
    onehots, gates, idxs = [], [], []
    for j in range(k):
        mx = jnp.max(work, axis=-1, keepdims=True)                              # [tT,1]
        # first-occurrence tie-break (matches lax.top_k on distinct floats)
        idx = jnp.min(jnp.where(work == mx, eiota, E), axis=-1, keepdims=True)  # [tT,1]
        oh = eiota == idx                                                        # [tT,E]
        onehots.append(oh.astype(jnp.bfloat16))
        gates.append(mx)
        idxs.append(idx)
        if j + 1 < k:
            work = jnp.where(oh, -jnp.inf, work)

    # ---- fused within-tile cumulative counts: one bf16 MXU matmul --------
    # tri is built in-kernel (two iotas + compare): no O(T^2) HBM tensor.
    r = lax.broadcasted_iota(jnp.int32, (tT, tT), 0)
    c = lax.broadcasted_iota(jnp.int32, (tT, tT), 1)
    tri = (r >= c).astype(jnp.bfloat16)                                          # [tT,tT]

    oh_cat = jnp.concatenate(onehots, axis=-1)                                   # [tT,k*E] bf16
    cum = jnp.dot(tri, oh_cat, preferred_element_type=jnp.float32)               # [tT,k*E] f32 (exact counts)

    # ---- within-choice GLOBAL rank = carried count + within-tile cumsum --
    ranks = []
    for j in range(k):
        cum_j = cum[:, j * E:(j + 1) * E] + carry_ref[0:1, j * E:(j + 1) * E]    # [tT,E]
        rank_j = jnp.sum(onehots[j].astype(jnp.float32) * cum_j,
                         axis=-1, keepdims=True)                                 # [tT,1]  (>= 1)
        ranks.append(rank_j)

    idx_ref[0] = jnp.concatenate(idxs, axis=-1)
    gate_ref[0] = jnp.concatenate(gates, axis=-1)
    rank_ref[0] = jnp.concatenate(ranks, axis=-1)

    # carry += this tile's per-choice per-expert totals (last row of cumsum)
    carry_ref[...] = carry_ref[...] + cum[tT - 1:tT, :]
    # resident output (constant block index across tiles): final value after
    # the last tile is what gets written back per group.
    totals_ref[0] = carry_ref[...]


# --------------------------------------------------------------------------
# Kernel B: build lane-dense flat combine/dispatch.  No cross-tile state.
# --------------------------------------------------------------------------
def _build_kernel(idx_ref, gate_ref, rank_ref, base_ref, combine_ref, dispatch_ref,
                  *, k, num_experts, capacity, ec_pad):
    E, C = num_experts, capacity
    idxs = idx_ref[0]      # [tT,k] i32
    gates = gate_ref[0]    # [tT,k] f32
    ranks = rank_ref[0]    # [tT,k] f32
    tT = idxs.shape[0]

    eiota = lax.broadcasted_iota(jnp.int32, (tT, E), 1)
    fiota = lax.broadcasted_iota(jnp.int32, (tT, ec_pad), 1)

    comb = jnp.zeros((tT, ec_pad), jnp.float32)
    disp = None
    for j in range(k):
        idx_j = idxs[:, j:j + 1]
        gate_j = gates[:, j:j + 1]
        rank_j = ranks[:, j:j + 1]
        # tokens claimed by earlier choices at this token's expert (E-wide gather)
        base_row = base_ref[0][0:1, j * E:(j + 1) * E]                            # [1,E]
        base_j = jnp.sum(jnp.where(eiota == idx_j, base_row, 0.0),
                         axis=-1, keepdims=True)                                  # [tT,1]
        slot = rank_j - 1.0 + base_j                                              # [tT,1] >= 0, exact ints
        # validity folded into the narrow position (no [tT,EC]-wide AND)
        pos = jnp.where(slot < float(C), idx_j * C + slot.astype(jnp.int32), -1)  # [tT,1]
        hit = fiota == pos                                                        # [tT,EC_pad]
        comb = jnp.where(hit, gate_j, comb)
        disp = hit if disp is None else jnp.logical_or(disp, hit)

    combine_ref[0] = comb.astype(combine_ref.dtype)
    dispatch_ref[0] = disp.astype(jnp.int8)


# --------------------------------------------------------------------------
# Wrapper
# --------------------------------------------------------------------------
def topk_router(router_probs, expert_capacity, k=K_VALUE, combine_dtype=jnp.float32):
    """Pallas implementation of TopKRouter.forward -> (combine_array, dispatch_mask).

    combine_dtype=jnp.bfloat16 is a legal option if downstream tolerates it
    (cuts ~40% HBM writeback on v5e/v6e); default f32 matches the torch module.
    """
    G, T, E = router_probs.shape
    assert E >= k, "TopKRouter kernel assumes num_experts >= k"
    C = int(expert_capacity)
    EC = E * C
    kE = k * E

    # Pad the flat lane axis to a multiple of 128 only when the relative
    # padding overhead is small (production sizes); never blow up tiny outputs.
    if EC % 128 == 0 or EC < 128:
        ECp = EC
    else:
        ECp = _round_up(EC, 128)

    # --- tile sizes (independent for the two kernels) ---------------------
    tTa = _pick_tile(T, 512)                                   # select kernel: tri is tTa^2
    rows_budget_b = max(8, (12 << 20) // max(ECp * 26, 1))     # build kernel: sized by EC width
    tTb = _pick_tile(T, rows_budget_b)
    nTa, nTb = T // tTa, T // tTb

    # --- VMEM budgets (explicit, capped at 64 MiB for v7x safety) ---------
    est_a = (2 * tTa * E * 4 + 6 * tTa * k * 4 + 4 * kE * 4
             + tTa * tTa * 2 + tTa * kE * 8 + 4 * tTa * E * 4)
    est_b = 2 * tTb * ECp * (4 + 1) + 5 * tTb * ECp * 4 + 8 * tTb * k * 4 + 2 * kE * 4
    vmem_a = _vmem_limit(2 * est_a)
    vmem_b = _vmem_limit(2 * est_b)

    # ---------------- pass 1: select + rank + per-choice totals -----------
    sel = functools.partial(_select_kernel, k=k)
    idx, gate, rank, totals = pl.pallas_call(
        sel,
        out_shape=(
            jax.ShapeDtypeStruct((G, T, k), jnp.int32),
            jax.ShapeDtypeStruct((G, T, k), jnp.float32),
            jax.ShapeDtypeStruct((G, T, k), jnp.float32),
            jax.ShapeDtypeStruct((G, 1, kE), jnp.float32),
        ),
        grid=(G, nTa),
        in_specs=[pl.BlockSpec((1, tTa, E), lambda g, m: (g, m, 0))],
        out_specs=(
            pl.BlockSpec((1, tTa, k), lambda g, m: (g, m, 0)),
            pl.BlockSpec((1, tTa, k), lambda g, m: (g, m, 0)),
            pl.BlockSpec((1, tTa, k), lambda g, m: (g, m, 0)),
            pl.BlockSpec((1, 1, kE), lambda g, m: (g, 0, 0)),   # resident across tiles
        ),
        scratch_shapes=[pltpu.VMEM((1, kE), jnp.float32)],       # carried per-choice counts
        compiler_params=pltpu.CompilerParams(
            dimension_semantics=("parallel", "arbitrary"),
            vmem_limit_bytes=vmem_a,
        ),
    )(router_probs)

    # ---------------- tiny glue: exclusive cumsum over the choice axis ----
    N = totals.reshape(G, k, E)
    base = (jnp.cumsum(N, axis=1) - N).reshape(G, 1, kE)         # A_j(e) = sum_{j'<j} N_{j'}(e)

    # ---------------- pass 2: build flat combine / dispatch ---------------
    build = functools.partial(_build_kernel, k=k, num_experts=E, capacity=C, ec_pad=ECp)
    combine_flat, dispatch_flat = pl.pallas_call(
        build,
        out_shape=(
            jax.ShapeDtypeStruct((G, T, ECp), combine_dtype),
            jax.ShapeDtypeStruct((G, T, ECp), jnp.int8),
        ),
        grid=(G, nTb),
        in_specs=[
            pl.BlockSpec((1, tTb, k), lambda g, m: (g, m, 0)),
            pl.BlockSpec((1, tTb, k), lambda g, m: (g, m, 0)),
            pl.BlockSpec((1, tTb, k), lambda g, m: (g, m, 0)),
            pl.BlockSpec((1, 1, kE), lambda g, m: (g, 0, 0)),
        ],
        out_specs=(
            pl.BlockSpec((1, tTb, ECp), lambda g, m: (g, m, 0)),
            pl.BlockSpec((1, tTb, ECp), lambda g, m: (g, m, 0)),
        ),
        compiler_params=pltpu.CompilerParams(
            dimension_semantics=("parallel", "parallel"),        # no sequential state
            vmem_limit_bytes=vmem_b,
        ),
    )(idx, gate, rank, base)

    if ECp != EC:
        combine_flat = combine_flat[..., :EC]
        dispatch_flat = dispatch_flat[..., :EC]
    combine = combine_flat.reshape(G, T, E, C)
    dispatch = dispatch_flat.reshape(G, T, E, C).astype(jnp.bool_)
    return combine, dispatch


# --------------------------------------------------------------------------
# Pure-JAX mirror of the torch forward for validation.
# --------------------------------------------------------------------------
def _reference(router_probs, expert_capacity, k=K_VALUE):
    G, T, E = router_probs.shape
    _, expert_index = lax.top_k(router_probs, k)                 # [G, T, k]
    ei = jnp.transpose(expert_index, (0, 2, 1)).reshape(G, -1)   # [G, k*T] (k-major)
    mask = jax.nn.one_hot(ei, E, dtype=jnp.int32)                # [G, k*T, E]
    prio = jnp.cumsum(mask, axis=1) * mask - 1
    prio = prio.reshape(G, k, T, E).transpose(0, 2, 1, 3).max(axis=2)  # [G, T, E]
    valid = (prio >= 0) & (prio < expert_capacity)
    prio = jnp.where(valid, prio, 0)
    dispatch = jax.nn.one_hot(prio, expert_capacity, dtype=jnp.bool_) & valid[..., None]
    combine = router_probs[..., None] * dispatch
    return combine, dispatch


if __name__ == "__main__":
    G, T, E = 2, 8, 8          # num_groups, tokens_per_group, num_experts
    CAP = 4                    # expert_capacity (>= min_capacity=4)

    key = jax.random.PRNGKey(0)
    logits = jax.random.normal(key, (G, T, E), dtype=jnp.float32)
    router_probs = jax.nn.softmax(logits, axis=-1)

    run = jax.jit(lambda p: topk_router(p, CAP))
    combine, dispatch = run(router_probs)
    jax.block_until_ready((combine, dispatch))

    ref_combine, ref_dispatch = _reference(router_probs, CAP)
    assert combine.shape == (G, T, E, CAP) and combine.dtype == jnp.float32
    assert dispatch.shape == (G, T, E, CAP) and dispatch.dtype == jnp.bool_
    assert jnp.array_equal(dispatch, ref_dispatch)
    assert jnp.allclose(combine, ref_combine, atol=1e-6)

    print("KERNEL_OK")
</pallas_src>

<mosaic_0001>
module attributes {stable_mosaic.version = 11 : i64} {
  func.func @_select_kernel(%arg0: i32, %arg1: i32, %arg2: memref<1x8x8xf32, #tpu.memory_space<vmem>>, %arg3: memref<1x8x2xi32, #tpu.memory_space<vmem>>, %arg4: memref<1x8x2xf32, #tpu.memory_space<vmem>>, %arg5: memref<1x8x2xf32, #tpu.memory_space<vmem>>, %arg6: memref<1x1x16xf32, #tpu.memory_space<vmem>>, %arg7: memref<1x16xf32, #tpu.memory_space<vmem>>) attributes {dimension_semantics = [#tpu.dimension_semantics<parallel>, #tpu.dimension_semantics<arbitrary>], iteration_bounds = array<i64: 2, 1>, scalar_prefetch = 0 : i64, scratch_operands = 1 : i64, tpu.core_type = #tpu.core_type<tc>, window_params = [{transform_indices = @transform_0, window_bounds = array<i64: 1, 8, 8>}, {transform_indices = @transform_1, window_bounds = array<i64: 1, 8, 2>}, {transform_indices = @transform_2, window_bounds = array<i64: 1, 8, 2>}, {transform_indices = @transform_3, window_bounds = array<i64: 1, 8, 2>}, {transform_indices = @transform_4, window_bounds = array<i64: 1, 1, 16>}]} {
    %c0_i32 = arith.constant 0 : i32
    %0 = arith.cmpi eq, %arg1, %c0_i32 : i32
    %1 = arith.extui %0 : i1 to i32
    %c0_i32_0 = arith.constant 0 : i32
    %2 = arith.cmpi ne, %1, %c0_i32_0 : i32
    scf.if %2 {
      %cst_32 = arith.constant 0.000000e+00 : f32
      %78 = vector.broadcast %cst_32 : f32 to vector<1x16xf32>
      %c0_33 = arith.constant 0 : index
      %c0_34 = arith.constant 0 : index
      %79 = vector.load %arg7[%c0_33, %c0_34] : memref<1x16xf32, #tpu.memory_space<vmem>>, vector<1x16xf32>
      tpu.vector_store %arg7[%c0_33, %c0_34], %78 {strides = array<i32>} : memref<1x16xf32, #tpu.memory_space<vmem>>, vector<1x16xf32>,
    } else {
    }
    %c0 = arith.constant 0 : index
    %c0_1 = arith.constant 0 : index
    %c0_2 = arith.constant 0 : index
    %3 = vector.load %arg2[%c0, %c0_1, %c0_2] : memref<1x8x8xf32, #tpu.memory_space<vmem>>, vector<1x8x8xf32>
    %4 = vector.shape_cast %3 : vector<1x8x8xf32> to vector<8x8xf32>
    %5 = tpu.iota {dimensions = array<i32: 1>} : vector<8x8xi32>
    %cst = arith.constant dense<0xFF800000> : vector<8xf32>
    %6 = vector.multi_reduction <maximumf>, %4, %cst [1] : vector<8x8xf32> to vector<8xf32>
    %7 = vector.shape_cast %6 : vector<8xf32> to vector<8x1xf32>
    %8 = vector.broadcast %7 : vector<8x1xf32> to vector<8x8xf32>
    %9 = arith.cmpf oeq, %4, %8 : vector<8x8xf32>
    %c8_i32 = arith.constant 8 : i32
    %10 = vector.broadcast %c8_i32 : i32 to vector<8x8xi32>
    %11 = arith.select %9, %5, %10 : vector<8x8xi1>, vector<8x8xi32>
    %cst_3 = arith.constant dense<2147483647> : vector<8xi32>
    %12 = vector.multi_reduction <minsi>, %11, %cst_3 [1] : vector<8x8xi32> to vector<8xi32>
    %13 = vector.shape_cast %12 : vector<8xi32> to vector<8x1xi32>
    %14 = vector.broadcast %13 : vector<8x1xi32> to vector<8x8xi32>
    %15 = arith.cmpi eq, %5, %14 : vector<8x8xi32>
    %16 = arith.extui %15 : vector<8x8xi1> to vector<8x8xi32>
    %17 = arith.sitofp %16 : vector<8x8xi32> to vector<8x8xf32>
    %18 = arith.truncf %17 : vector<8x8xf32> to vector<8x8xbf16>
    %cst_4 = arith.constant 0xFF800000 : f32
    %19 = vector.broadcast %cst_4 : f32 to vector<8x8xf32>
    %20 = arith.select %15, %19, %4 : vector<8x8xi1>, vector<8x8xf32>
    %cst_5 = arith.constant dense<0xFF800000> : vector<8xf32>
    %21 = vector.multi_reduction <maximumf>, %20, %cst_5 [1] : vector<8x8xf32> to vector<8xf32>
    %22 = vector.shape_cast %21 : vector<8xf32> to vector<8x1xf32>
    %23 = vector.broadcast %22 : vector<8x1xf32> to vector<8x8xf32>
    %24 = arith.cmpf oeq, %20, %23 : vector<8x8xf32>
    %c8_i32_6 = arith.constant 8 : i32
    %25 = vector.broadcast %c8_i32_6 : i32 to vector<8x8xi32>
    %26 = arith.select %24, %5, %25 : vector<8x8xi1>, vector<8x8xi32>
    %cst_7 = arith.constant dense<2147483647> : vector<8xi32>
    %27 = vector.multi_reduction <minsi>, %26, %cst_7 [1] : vector<8x8xi32> to vector<8xi32>
    %28 = vector.shape_cast %27 : vector<8xi32> to vector<8x1xi32>
    %29 = vector.broadcast %28 : vector<8x1xi32> to vector<8x8xi32>
    %30 = arith.cmpi eq, %5, %29 : vector<8x8xi32>
    %31 = arith.extui %30 : vector<8x8xi1> to vector<8x8xi32>
    %32 = arith.sitofp %31 : vector<8x8xi32> to vector<8x8xf32>
    %33 = arith.truncf %32 : vector<8x8xf32> to vector<8x8xbf16>
    %34 = tpu.iota {dimensions = array<i32: 0>} : vector<8x8xi32>
    %35 = tpu.iota {dimensions = array<i32: 1>} : vector<8x8xi32>
    %36 = arith.cmpi sge, %34, %35 : vector<8x8xi32>
    %37 = arith.extui %36 : vector<8x8xi1> to vector<8x8xi32>
    %38 = arith.sitofp %37 : vector<8x8xi32> to vector<8x8xf32>
    %39 = arith.truncf %38 : vector<8x8xf32> to vector<8x8xbf16>
    %40 = tpu.concatenate %18, %33 in 1 : vector<8x8xbf16>, vector<8x8xbf16> -> vector<8x16xbf16>
    %cst_8 = arith.constant dense<0.000000e+00> : vector<8x16xf32>
    %41 = tpu.matmul %39, %40, %cst_8 {dimension_numbers = #tpu.dot_dimension_numbers<[1], [0], [0], [1], [0, 0, 1, 1], [], []>} : vector<8x8xbf16>, vector<8x16xbf16>, vector<8x16xf32> -> vector<8x16xf32>
    %42 = vector.extract_strided_slice %41 {offsets = [0, 0], sizes = [8, 8], strides = [1, 1]} : vector<8x16xf32> to vector<8x8xf32>
    %c0_9 = arith.constant 0 : index
    %c0_10 = arith.constant 0 : index
    %43 = vector.load %arg7[%c0_9, %c0_10] : memref<1x16xf32, #tpu.memory_space<vmem>>, vector<1x8xf32>
    %44 = vector.broadcast %43 : vector<1x8xf32> to vector<8x8xf32>
    %45 = arith.addf %42, %44 : vector<8x8xf32>
    %46 = arith.extf %18 : vector<8x8xbf16> to vector<8x8xf32>
    %47 = arith.mulf %46, %45 : vector<8x8xf32>
    %cst_11 = arith.constant dense<0.000000e+00> : vector<8xf32>
    %48 = vector.multi_reduction <add>, %47, %cst_11 [1] : vector<8x8xf32> to vector<8xf32>
    %49 = vector.shape_cast %48 : vector<8xf32> to vector<8x1xf32>
    %50 = vector.extract_strided_slice %41 {offsets = [0, 8], sizes = [8, 8], strides = [1, 1]} : vector<8x16xf32> to vector<8x8xf32>
    %c0_12 = arith.constant 0 : index
    %c8 = arith.constant 8 : index
    %51 = vector.load %arg7[%c0_12, %c8] : memref<1x16xf32, #tpu.memory_space<vmem>>, vector<1x8xf32>
    %52 = vector.broadcast %51 : vector<1x8xf32> to vector<8x8xf32>
    %53 = arith.addf %50, %52 : vector<8x8xf32>
    %54 = arith.extf %33 : vector<8x8xbf16> to vector<8x8xf32>
    %55 = arith.mulf %54, %53 : vector<8x8xf32>
    %cst_13 = arith.constant dense<0.000000e+00> : vector<8xf32>
    %56 = vector.multi_reduction <add>, %55, %cst_13 [1] : vector<8x8xf32> to vector<8xf32>
    %57 = vector.shape_cast %56 : vector<8xf32> to vector<8x1xf32>
    %58 = tpu.concatenate %13, %28 in 1 : vector<8x1xi32>, vector<8x1xi32> -> vector<8x2xi32>
    %c0_14 = arith.constant 0 : index
    %c0_15 = arith.constant 0 : index
    %c0_16 = arith.constant 0 : index
    %59 = vector.load %arg3[%c0_14, %c0_15, %c0_16] : memref<1x8x2xi32, #tpu.memory_space<vmem>>, vector<1x8x2xi32>
    %60 = vector.shape_cast %59 : vector<1x8x2xi32> to vector<8x2xi32>
    %61 = vector.shape_cast %58 : vector<8x2xi32> to vector<1x8x2xi32>
    tpu.vector_store %arg3[%c0_14, %c0_15, %c0_16], %61 {strides = array<i32>} : memref<1x8x2xi32, #tpu.memory_space<vmem>>, vector<1x8x2xi32>,
    %62 = tpu.concatenate %7, %22 in 1 : vector<8x1xf32>, vector<8x1xf32> -> vector<8x2xf32>
    %c0_17 = arith.constant 0 : index
    %c0_18 = arith.constant 0 : index
    %c0_19 = arith.constant 0 : index
    %63 = vector.load %arg4[%c0_17, %c0_18, %c0_19] : memref<1x8x2xf32, #tpu.memory_space<vmem>>, vector<1x8x2xf32>
    %64 = vector.shape_cast %63 : vector<1x8x2xf32> to vector<8x2xf32>
    %65 = vector.shape_cast %62 : vector<8x2xf32> to vector<1x8x2xf32>
    tpu.vector_store %arg4[%c0_17, %c0_18, %c0_19], %65 {strides = array<i32>} : memref<1x8x2xf32, #tpu.memory_space<vmem>>, vector<1x8x2xf32>,
    %66 = tpu.concatenate %49, %57 in 1 : vector<8x1xf32>, vector<8x1xf32> -> vector<8x2xf32>
    %c0_20 = arith.constant 0 : index
    %c0_21 = arith.constant 0 : index
    %c0_22 = arith.constant 0 : index
    %67 = vector.load %arg5[%c0_20, %c0_21, %c0_22] : memref<1x8x2xf32, #tpu.memory_space<vmem>>, vector<1x8x2xf32>
    %68 = vector.shape_cast %67 : vector<1x8x2xf32> to vector<8x2xf32>
    %69 = vector.shape_cast %66 : vector<8x2xf32> to vector<1x8x2xf32>
    tpu.vector_store %arg5[%c0_20, %c0_21, %c0_22], %69 {strides = array<i32>} : memref<1x8x2xf32, #tpu.memory_space<vmem>>, vector<1x8x2xf32>,
    %c0_23 = arith.constant 0 : index
    %c0_24 = arith.constant 0 : index
    %70 = vector.load %arg7[%c0_23, %c0_24] : memref<1x16xf32, #tpu.memory_space<vmem>>, vector<1x16xf32>
    %71 = vector.extract_strided_slice %41 {offsets = [7, 0], sizes = [1, 16], strides = [1, 1]} : vector<8x16xf32> to vector<1x16xf32>
    %72 = arith.addf %70, %71 : vector<1x16xf32>
    %c0_25 = arith.constant 0 : index
    %c0_26 = arith.constant 0 : index
    %73 = vector.load %arg7[%c0_25, %c0_26] : memref<1x16xf32, #tpu.memory_space<vmem>>, vector<1x16xf32>
    tpu.vector_store %arg7[%c0_25, %c0_26], %72 {strides = array<i32>} : memref<1x16xf32, #tpu.memory_space<vmem>>, vector<1x16xf32>,
    %c0_27 = arith.constant 0 : index
    %c0_28 = arith.constant 0 : index
    %74 = vector.load %arg7[%c0_27, %c0_28] : memref<1x16xf32, #tpu.memory_space<vmem>>, vector<1x16xf32>
    %c0_29 = arith.constant 0 : index
    %c0_30 = arith.constant 0 : index
    %c0_31 = arith.constant 0 : index
    %75 = vector.load %arg6[%c0_29, %c0_30, %c0_31] : memref<1x1x16xf32, #tpu.memory_space<vmem>>, vector<1x1x16xf32>
    %76 = vector.shape_cast %75 : vector<1x1x16xf32> to vector<1x16xf32>
    %77 = vector.shape_cast %74 : vector<1x16xf32> to vector<1x1x16xf32>
    tpu.vector_store %arg6[%c0_29, %c0_30, %c0_31], %77 {strides = array<i32>} : memref<1x1x16xf32, #tpu.memory_space<vmem>>, vector<1x1x16xf32>,
    return
  }
  func.func @transform_0(%arg0: i32, %arg1: i32) -> (i32, i32, i32) {
    %c0_i32 = arith.constant 0 : i32
    %c0_i32_0 = arith.constant 0 : i32
    return %arg0, %arg1, %c0_i32 : i32, i32, i32
  }
  func.func @transform_1(%arg0: i32, %arg1: i32) -> (i32, i32, i32) {
    %c0_i32 = arith.constant 0 : i32
    %c0_i32_0 = arith.constant 0 : i32
    return %arg0, %arg1, %c0_i32 : i32, i32, i32
  }
  func.func @transform_2(%arg0: i32, %arg1: i32) -> (i32, i32, i32) {
    %c0_i32 = arith.constant 0 : i32
    %c0_i32_0 = arith.constant 0 : i32
    return %arg0, %arg1, %c0_i32 : i32, i32, i32
  }
  func.func @transform_3(%arg0: i32, %arg1: i32) -> (i32, i32, i32) {
    %c0_i32 = arith.constant 0 : i32
    %c0_i32_0 = arith.constant 0 : i32
    return %arg0, %arg1, %c0_i32 : i32, i32, i32
  }
  func.func @transform_4(%arg0: i32, %arg1: i32) -> (i32, i32, i32) {
    %c0_i32 = arith.constant 0 : i32
    %c0_i32_0 = arith.constant 0 : i32
    %c0_i32_1 = arith.constant 0 : i32
    return %arg0, %c0_i32, %c0_i32_0 : i32, i32, i32
  }
}

module attributes {stable_mosaic.version = 11 : i64} {
  func.func @_build_kernel(%arg0: i32, %arg1: i32, %arg2: memref<1x8x2xi32, #tpu.memory_space<vmem>>, %arg3: memref<1x8x2xf32, #tpu.memory_space<vmem>>, %arg4: memref<1x8x2xf32, #tpu.memory_space<vmem>>, %arg5: memref<1x1x16xf32, #tpu.memory_space<vmem>>, %arg6: memref<1x8x32xf32, #tpu.memory_space<vmem>>, %arg7: memref<1x8x32xi8, #tpu.memory_space<vmem>>) attributes {dimension_semantics = [#tpu.dimension_semantics<parallel>, #tpu.dimension_semantics<parallel>], iteration_bounds = array<i64: 2, 1>, scalar_prefetch = 0 : i64, scratch_operands = 0 : i64, tpu.core_type = #tpu.core_type<tc>, window_params = [{transform_indices = @transform_0, window_bounds = array<i64: 1, 8, 2>}, {transform_indices = @transform_1, window_bounds = array<i64: 1, 8, 2>}, {transform_indices = @transform_2, window_bounds = array<i64: 1, 8, 2>}, {transform_indices = @transform_3, window_bounds = array<i64: 1, 1, 16>}, {transform_indices = @transform_4, window_bounds = array<i64: 1, 8, 32>}, {transform_indices = @transform_5, window_bounds = array<i64: 1, 8, 32>}]} {
    %c0 = arith.constant 0 : index
    %c0_0 = arith.constant 0 : index
    %c0_1 = arith.constant 0 : index
    %0 = vector.load %arg2[%c0, %c0_0, %c0_1] : memref<1x8x2xi32, #tpu.memory_space<vmem>>, vector<1x8x2xi32>
    %1 = vector.shape_cast %0 : vector<1x8x2xi32> to vector<8x2xi32>
    %c0_2 = arith.constant 0 : index
    %c0_3 = arith.constant 0 : index
    %c0_4 = arith.constant 0 : index
    %2 = vector.load %arg3[%c0_2, %c0_3, %c0_4] : memref<1x8x2xf32, #tpu.memory_space<vmem>>, vector<1x8x2xf32>
    %3 = vector.shape_cast %2 : vector<1x8x2xf32> to vector<8x2xf32>
    %c0_5 = arith.constant 0 : index
    %c0_6 = arith.constant 0 : index
    %c0_7 = arith.constant 0 : index
    %4 = vector.load %arg4[%c0_5, %c0_6, %c0_7] : memref<1x8x2xf32, #tpu.memory_space<vmem>>, vector<1x8x2xf32>
    %5 = vector.shape_cast %4 : vector<1x8x2xf32> to vector<8x2xf32>
    %6 = tpu.iota {dimensions = array<i32: 1>} : vector<8x8xi32>
    %7 = tpu.iota {dimensions = array<i32: 1>} : vector<8x32xi32>
    %cst = arith.constant 0.000000e+00 : f32
    %8 = vector.broadcast %cst : f32 to vector<8x32xf32>
    %9 = vector.extract_strided_slice %1 {offsets = [0, 0], sizes = [8, 1], strides = [1, 1]} : vector<8x2xi32> to vector<8x1xi32>
    %10 = vector.extract_strided_slice %3 {offsets = [0, 0], sizes = [8, 1], strides = [1, 1]} : vector<8x2xf32> to vector<8x1xf32>
    %11 = vector.extract_strided_slice %5 {offsets = [0, 0], sizes = [8, 1], strides = [1, 1]} : vector<8x2xf32> to vector<8x1xf32>
    %c0_8 = arith.constant 0 : index
    %c0_9 = arith.constant 0 : index
    %c0_10 = arith.constant 0 : index
    %12 = vector.load %arg5[%c0_8, %c0_9, %c0_10] : memref<1x1x16xf32, #tpu.memory_space<vmem>>, vector<1x1x16xf32>
    %13 = vector.shape_cast %12 : vector<1x1x16xf32> to vector<1x16xf32>
    %14 = vector.extract_strided_slice %13 {offsets = [0, 0], sizes = [1, 8], strides = [1, 1]} : vector<1x16xf32> to vector<1x8xf32>
    %15 = vector.broadcast %9 : vector<8x1xi32> to vector<8x8xi32>
    %16 = arith.cmpi eq, %6, %15 : vector<8x8xi32>
    %cst_11 = arith.constant 0.000000e+00 : f32
    %17 = vector.shape_cast %14 : vector<1x8xf32> to vector<1x8xf32>
    %18 = vector.broadcast %17 : vector<1x8xf32> to vector<8x8xf32>
    %19 = vector.broadcast %cst_11 : f32 to vector<8x8xf32>
    %20 = arith.select %16, %18, %19 : vector<8x8xi1>, vector<8x8xf32>
    %cst_12 = arith.constant dense<0.000000e+00> : vector<8xf32>
    %21 = vector.multi_reduction <add>, %20, %cst_12 [1] : vector<8x8xf32> to vector<8xf32>
    %22 = vector.shape_cast %21 : vector<8xf32> to vector<8x1xf32>
    %cst_13 = arith.constant 1.000000e+00 : f32
    %23 = vector.broadcast %cst_13 : f32 to vector<8x1xf32>
    %24 = arith.subf %11, %23 : vector<8x1xf32>
    %25 = arith.addf %24, %22 : vector<8x1xf32>
    %cst_14 = arith.constant 4.000000e+00 : f32
    %26 = vector.broadcast %cst_14 : f32 to vector<8x1xf32>
    %27 = arith.cmpf olt, %25, %26 : vector<8x1xf32>
    %c4_i32 = arith.constant 4 : i32
    %28 = vector.broadcast %c4_i32 : i32 to vector<8x1xi32>
    %29 = arith.muli %9, %28 : vector<8x1xi32>
    %30 = arith.fptosi %25 : vector<8x1xf32> to vector<8x1xi32>
    %31 = arith.addi %29, %30 : vector<8x1xi32>
    %c-1_i32 = arith.constant -1 : i32
    %32 = vector.broadcast %c-1_i32 : i32 to vector<8x1xi32>
    %33 = arith.select %27, %31, %32 : vector<8x1xi1>, vector<8x1xi32>
    %34 = vector.broadcast %33 : vector<8x1xi32> to vector<8x32xi32>
    %35 = arith.cmpi eq, %7, %34 : vector<8x32xi32>
    %36 = vector.shape_cast %10 : vector<8x1xf32> to vector<8x1xf32>
    %37 = vector.broadcast %36 : vector<8x1xf32> to vector<8x32xf32>
    %38 = arith.select %35, %37, %8 : vector<8x32xi1>, vector<8x32xf32>
    %39 = vector.extract_strided_slice %1 {offsets = [0, 1], sizes = [8, 1], strides = [1, 1]} : vector<8x2xi32> to vector<8x1xi32>
    %40 = vector.extract_strided_slice %3 {offsets = [0, 1], sizes = [8, 1], strides = [1, 1]} : vector<8x2xf32> to vector<8x1xf32>
    %41 = vector.extract_strided_slice %5 {offsets = [0, 1], sizes = [8, 1], strides = [1, 1]} : vector<8x2xf32> to vector<8x1xf32>
    %c0_15 = arith.constant 0 : index
    %c0_16 = arith.constant 0 : index
    %c0_17 = arith.constant 0 : index
    %42 = vector.load %arg5[%c0_15, %c0_16, %c0_17] : memref<1x1x16xf32, #tpu.memory_space<vmem>>, vector<1x1x16xf32>
    %43 = vector.shape_cast %42 : vector<1x1x16xf32> to vector<1x16xf32>
    %44 = vector.extract_strided_slice %43 {offsets = [0, 8], sizes = [1, 8], strides = [1, 1]} : vector<1x16xf32> to vector<1x8xf32>
    %45 = vector.broadcast %39 : vector<8x1xi32> to vector<8x8xi32>
    %46 = arith.cmpi eq, %6, %45 : vector<8x8xi32>
    %cst_18 = arith.constant 0.000000e+00 : f32
    %47 = vector.shape_cast %44 : vector<1x8xf32> to vector<1x8xf32>
    %48 = vector.broadcast %47 : vector<1x8xf32> to vector<8x8xf32>
    %49 = vector.broadcast %cst_18 : f32 to vector<8x8xf32>
    %50 = arith.select %46, %48, %49 : vector<8x8xi1>, vector<8x8xf32>
    %cst_19 = arith.constant dense<0.000000e+00> : vector<8xf32>
    %51 = vector.multi_reduction <add>, %50, %cst_19 [1] : vector<8x8xf32> to vector<8xf32>
    %52 = vector.shape_cast %51 : vector<8xf32> to vector<8x1xf32>
    %cst_20 = arith.constant 1.000000e+00 : f32
    %53 = vector.broadcast %cst_20 : f32 to vector<8x1xf32>
    %54 = arith.subf %41, %53 : vector<8x1xf32>
    %55 = arith.addf %54, %52 : vector<8x1xf32>
    %cst_21 = arith.constant 4.000000e+00 : f32
    %56 = vector.broadcast %cst_21 : f32 to vector<8x1xf32>
    %57 = arith.cmpf olt, %55, %56 : vector<8x1xf32>
    %c4_i32_22 = arith.constant 4 : i32
    %58 = vector.broadcast %c4_i32_22 : i32 to vector<8x1xi32>
    %59 = arith.muli %39, %58 : vector<8x1xi32>
    %60 = arith.fptosi %55 : vector<8x1xf32> to vector<8x1xi32>
    %61 = arith.addi %59, %60 : vector<8x1xi32>
    %c-1_i32_23 = arith.constant -1 : i32
    %62 = vector.broadcast %c-1_i32_23 : i32 to vector<8x1xi32>
    %63 = arith.select %57, %61, %62 : vector<8x1xi1>, vector<8x1xi32>
    %64 = vector.broadcast %63 : vector<8x1xi32> to vector<8x32xi32>
    %65 = arith.cmpi eq, %7, %64 : vector<8x32xi32>
    %66 = vector.shape_cast %40 : vector<8x1xf32> to vector<8x1xf32>
    %67 = vector.broadcast %66 : vector<8x1xf32> to vector<8x32xf32>
    %68 = arith.select %65, %67, %38 : vector<8x32xi1>, vector<8x32xf32>
    %69 = arith.ori %35, %65 : vector<8x32xi1>
    %c0_24 = arith.constant 0 : index
    %c0_25 = arith.constant 0 : index
    %c0_26 = arith.constant 0 : index
    %70 = vector.load %arg6[%c0_24, %c0_25, %c0_26] : memref<1x8x32xf32, #tpu.memory_space<vmem>>, vector<1x8x32xf32>
    %71 = vector.shape_cast %70 : vector<1x8x32xf32> to vector<8x32xf32>
    %72 = vector.shape_cast %68 : vector<8x32xf32> to vector<1x8x32xf32>
    tpu.vector_store %arg6[%c0_24, %c0_25, %c0_26], %72 {strides = array<i32>} : memref<1x8x32xf32, #tpu.memory_space<vmem>>, vector<1x8x32xf32>,
    %73 = arith.extui %69 : vector<8x32xi1> to vector<8x32xi8>
    %c0_27 = arith.constant 0 : index
    %c0_28 = arith.constant 0 : index
    %c0_29 = arith.constant 0 : index
    %74 = vector.load %arg7[%c0_27, %c0_28, %c0_29] : memref<1x8x32xi8, #tpu.memory_space<vmem>>, vector<1x8x32xi8>
    %75 = vector.shape_cast %74 : vector<1x8x32xi8> to vector<8x32xi8>
    %76 = vector.shape_cast %73 : vector<8x32xi8> to vector<1x8x32xi8>
    tpu.vector_store %arg7[%c0_27, %c0_28, %c0_29], %76 {strides = array<i32>} : memref<1x8x32xi8, #tpu.memory_space<vmem>>, vector<1x8x32xi8>,
    return
  }
  func.func @transform_0(%arg0: i32, %arg1: i32) -> (i32, i32, i32) {
    %c0_i32 = arith.constant 0 : i32
    %c0_i32_0 = arith.constant 0 : i32
    return %arg0, %arg1, %c0_i32 : i32, i32, i32
  }
  func.func @transform_1(%arg0: i32, %arg1: i32) -> (i32, i32, i32) {
    %c0_i32 = arith.constant 0 : i32
    %c0_i32_0 = arith.constant 0 : i32
    return %arg0, %arg1, %c0_i32 : i32, i32, i32
  }
  func.func @transform_2(%arg0: i32, %arg1: i32) -> (i32, i32, i32) {
    %c0_i32 = arith.constant 0 : i32
    %c0_i32_0 = arith.constant 0 : i32
    return %arg0, %arg1, %c0_i32 : i32, i32, i32
  }
  func.func @transform_3(%arg0: i32, %arg1: i32) -> (i32, i32, i32) {
    %c0_i32 = arith.constant 0 : i32
    %c0_i32_0 = arith.constant 0 : i32
    %c0_i32_1 = arith.constant 0 : i32
    return %arg0, %c0_i32, %c0_i32_0 : i32, i32, i32
  }
  func.func @transform_4(%arg0: i32, %arg1: i32) -> (i32, i32, i32) {
    %c0_i32 = arith.constant 0 : i32
    %c0_i32_0 = arith.constant 0 : i32
    return %arg0, %arg1, %c0_i32 : i32, i32, i32
  }
  func.func @transform_5(%arg0: i32, %arg1: i32) -> (i32, i32, i32) {
    %c0_i32 = arith.constant 0 : i32
    %c0_i32_0 = arith.constant 0 : i32
    return %arg0, %arg1, %c0_i32 : i32, i32, i32
  }
}

</mosaic_0001>

<bundles_post_ra>
// kernel: sub.0
= control target key start
LH: loop header
LB: loop body
LE: loop exit
PB: predicated region body
PF: predicated region fallthrough
CT: control target
= control target key end

     0   :  { %s56_s0 = inlined_call_operand.vmem [shape: f32[2,1,16], index: 0, kind: input, shape index: {}]   ;;  %s57_s1 = inlined_call_operand.vmem [shape: f32[2,1,16], index: 1, kind: input, shape index: {}]   ;;  %s58_s2 = inlined_call_operand.vmem [shape: f32[2,1,16], index: 2, kind: output, shape index: {}]  }
   0x1   :  { %v3_v0 = vld [vmem:[%s56_s0] sm:$0x1]  ;;  %v20_v2 = vld [vmem:[%s56_s0 + $0x1] sm:$0x1] }
   0x2   :  { %v4_v1 = vld [vmem:[%s57_s1] sm:$0x1]  ;;  %v21_v4 = vld [vmem:[%s57_s1 + $0x1] sm:$0x1] }
   0x3   :  { %v7_v3 = vsub.f32 %v3_v0, %v4_v1  ;;  %v16_v5 = vsub.f32 %v20_v2, %v21_v4 }
   0x5   :  { %9 = vst [vmem:[%s58_s2] sm:$0x1] %v7_v3  ;;  %22 = vst [vmem:[%s58_s2 + $0x1] sm:$0x1] %v16_v5 }

// kernel: _lambda_.2
= control target key start
LH: loop header
LB: loop body
LE: loop exit
PB: predicated region body
PF: predicated region fallthrough
CT: control target
= control target key end

     0   :  { %10 = vsyncpa [#allocation4], 0  ;;  %s1017_s0 = inlined_call_operand.hbm [shape: f32[2,8,8], index: 0, kind: input, shape index: {}]   ;;  %s1018_s1 = inlined_call_operand.vmem [shape: s32[2,8,2], index: 1, kind: output, shape index: {0}]   ;;  %s1019_s2 = inlined_call_operand.vmem [shape: f32[2,8,2], index: 2, kind: output, shape index: {1}]   ;;  %s1020_s3 = inlined_call_operand.vmem [shape: f32[2,8,2], index: 3, kind: output, shape index: {2}]   ;;  %s1021_s4 = inlined_call_operand.vmem [shape: f32[2,1,16], index: 4, kind: output, shape index: {3}]  }
   0x1   :  { %12 = vsyncpa [#allocation4 + $0x1], 0  ;;  %s844_s15 = smov 0   ;;  %s846_s16 = smov 0  }
   0x2   :  { %s848_s17 = smov 0   ;;  %s850_s18 = smov 0  }
   0x3   :  { %s852_s19 = smov 0   ;;  %s854_s20 = smov 0  }
   0x4 LB: > { %s645_s21 = sadd.s32 4294967295, %s811_s20   ;;  %s30_s22 = sadd.s32 1, %s807_s19  ;;  %s811_s20 = sphi %s854_s20, %s18_s20   ;;  %s807_s19 = sphi %s852_s19, %s1031_s19   ;;  %s803_s18 = sphi %s850_s18, %s1030_s18   ;;  %s799_s17 = sphi %s848_s17, %s1029_s17   ;;  %s795_s16 = sphi %s846_s16, %s1028_s16   ;;  %s791_s15 = sphi %s844_s15, %s1027_s15  }
   0x5   : > { %p32_p0 = scmp.ge.s32.totalorder %s30_s22, 2  ;;  %s39_s23 = sadd.s32 1, %s799_s17 }
   0x6   : > { %p46_p1 = scmp.ne.s32.totalorder %s799_s17, %s795_s16  ;;  %p47_p2 = scmp.eq.s32.totalorder %s811_s20, 0 }
   0x7   : > { %s1033_s22 = smov (%p32_p0, %s30_s22), 0  ;;  %p52_p4 = scmp.ne.s32.totalorder %s795_s16, %s791_s15 }
   0x8   : > { %p880_p3 = por %p47_p2, %p46_p1  ;;  %s34_s25 = ssub.s32 %s807_s19, %s1033_s22 }
   0x9   : > { %p53_p5 = scmp.eq.s32.totalorder %s645_s21, 0  ;;  %p37_p6 = scmp.eq.s32.totalorder %s34_s25, 0 }
   0xa   : > { %p677_p8 = scmp.lt.s32.totalorder %s811_s20, 2  ;;  %s186_s28 = sand.u32 1, %s799_s17  }
   0xb   : > { %p887_p7 = por %p53_p5, %p52_p4  ;;  %s650_s29 = sshll.u32 %s807_s19, 7 }
   0xc   : > { %s893_s27 = scalar_select %p37_p6, %s799_s17, %s39_s23  }
   0xd   : > { %s649_s30 = sshll.u32 %s186_s28, 3  ;;  %s900_s7 = scalar_lea.hbm %s1017_s0, %s650_s29 }
   0xe   : > { %s190_s8 = scalar_lea.vmem [#allocation3], %s649_s30  ;;  %p904_p9 = pnand %p677_p8, %p880_p3 }
   0xf   : > { %s198_s9 = sshll.u32 %s190_s8, 4  ;;  %s187_s11 = scalar_lea.sflag [#allocation4], %s186_s28  ;;  %s908_s9 = int_to_ptr.vmem [resolvable:$true] %s198_s9 }
  0x10   : > { %s731_s12 = scalar_lea.hbm %s900_s7, 128  ;;  %p733_p13 = pneg %p904_p9 }
  0x11   : > { %p732_p12 = scmp.ne.s32.totalorder %s900_s7, %s731_s12  ;;  %s736_s15 = scalar_lea.hbm %s1017_s0, 256 }
  0x12   : > { %p737_p2 = scmp.lt.u32.totalorder %s900_s7, %s1017_s0  ;;  %p738_p3 = scmp.lt.u32.totalorder %s736_s15, %s731_s12 }
  0x13   : > { %p734_p0 = pnand %p733_p13, %p732_p12  ;;  %p740_p5 = scmp.lt.u32.totalorder %s731_s12, %s900_s7 }
  0x14   : > { %p739_p4 = por %p738_p3, %p737_p2 }
  0x15   : > { %p735_p1 = pneg %p734_p0 }
  0x16   : > { %p741_p6 = por %p740_p5, %p739_p4 }
  0x18   : > { %p742_p8 = pnand %p741_p6, %p735_p1 }
  0x1a   : > { %745 = shalt.err (!%p742_p8)
}
  0x1b   : > { %s746_s24 = scalar_lea.vmem %s908_s9, 128  ;;  %s813_s25 = smov [#allocation3]  }
  0x1c   : > { %p747_p12 = scmp.ne.s32.totalorder %s908_s9, %s746_s24  ;;  %s751_s28 = sshll.u32 %s813_s25, 4  ;;  %s752_s28 = int_to_ptr.vmem [resolvable:$false] %s751_s28 }
  0x1d   : > { %s753_s29 = scalar_lea.vmem %s752_s28, 256  ;;  %p754_p11 = scmp.lt.s32.totalorder %s908_s9, %s752_s28 }
  0x1e   : > { %p749_p0 = pnand %p747_p12, %p733_p13  ;;  %p755_p2 = scmp.lt.s32.totalorder %s753_s29, %s746_s24 }
  0x20   : > { %p750_p10 = pneg %p749_p0  ;;  %p756_p3 = por %p755_p2, %p754_p11 }
  0x22   : > { %p757_p4 = pnand %p756_p3, %p750_p10 }
  0x24   : > { %760 = shalt.err (!%p757_p4)
}
  0x25   : > { %676 = dma.hbm_to_vmem [thread:$0]  (!%p904_p9), %s900_s7, 128, %s908_s9, %s187_s11  }
  0x26   : > { %p1025_p1 = scmp.lt.s32.totalorder %s811_s20, 3  ;;  %p1026_p5 = scmp.ge.s32.totalorder %s811_s20, 1 }
  0x28   : > { %p204_p13 = pnand %p1026_p5, %p1025_p1 }
  0x29   : > { %s209_s30 = sand.u32 (!%p204_p13), 1, %s795_s16  }
  0x2a   : > { %207 = sbr.rel (%p204_p13) target bundleno = 1533 (0x5fd), region = 24  ;;  %s652_s5 = sshll.u32 (!%p204_p13), %s209_s30, 3 }
  0x2b   : > { %s210_s6 = scalar_lea.sflag (!%p204_p13), [#allocation4], %s209_s30  ;;  %s213_s8 = scalar_lea.vmem (!%p204_p13), [#allocation3], %s652_s5 }
  0x31   : > { %786 = dma.done.wait (%p887_p7), %s210_s6, 128  }
  0x32   : > { %788 = vsyncadd (%p887_p7), %s210_s6, 4294967168  ;;  %vm291_vm0 = vcmask 64512   ;;  %v288_v0 = vld [vmem:[%s213_s8] sm:$0xff]  ;;  %v289_v2 = vlaneseq  ;;  %v814_v13 = vmov 0.0   ;;  %p257_p7 = scmp.lt.s32.totalorder %s803_s18, 1  ;;  %vm421_vm4 = vcmask 7168  }
  0x33   : > { %v292_v1 = vsel %vm291_vm0, %v288_v0, -inf  ;;  %665 = vmatprep.subr.bf16.mxu0 %v814_v13  ;;  %vm423_vm5 = vcmask 15360   ;;  %vm815_vm8 = vmmov 0   ;;  %vm286_vm9 = vcmask 122880   ;;  %s816_s14 = smov 8   ;;  %s818_s15 = smov 120  }
  0x34   : > { %293 = vmax.xlane.f32.xlu0 %v292_v1  ;;  %v948_v3 = vand.u32 127, %v289_v2  ;;  %s1035_s18 = smov (!%p257_p7, %s803_s18), 1  ;;  %667 = vmatprep.mubr.msk.bf16.mxu0 %vm815_vm8, %v814_v13  ;;  %287 = vst.msk [vmem:[#allocation2] sm:$0x1] %vm286_vm9, %v814_v13  ;;  %v342_v39 = vshrl.u32 %v289_v2, 7  ;;  %vm356_vm12 = vcmask 1043456  }
  0x35   : > { %s961_s26 = sshll.u32 %s1035_s18, 3  ;;  %v817_v47 = vmov 1966171168   ;;  %s280_s24 = scalar_lea.vmem %s1021_s4, %s1035_s18 }
  0x36   : > { %s270_s10 = scalar_lea.vmem %s1019_s2, %s961_s26  ;;  %s263_s13 = scalar_lea.vmem %s1018_s1, %s961_s26  ;;  %vm343_vm11 = vcmp.ge.s32.totalorder %v342_v39, %v948_v3  ;;  %v433_v48 = vunpack.c.l.s4 %v817_v47 }
  0x37   : > { %v658_v42 = vsel %vm343_vm11, 1.0, %v814_v13  ;;  %s277_s29 = scalar_lea.vmem %s1020_s3, %s961_s26 }
  0x38   : > { %v346_v46 = vpack.c.bf16 %v658_v42, %v658_v42  ;;  %v434_v49 = vunpack.c.0.s8 %v433_v48 }
  0x3a   : > { %v437_v51 = vsub.s32 %v434_v49, %v342_v39 }
  0x3b   : > { %v660_v50 = vld [vmem:[#allocation2] ss:$0 sm:$0xff] }
  0x3c   : > { %v429_v61 = vld [vmem:[#allocation2] sm:$0x1] }
  0xc1   : > { %v294_v4 = vpop.xlane.xlu0 %293 }
  0xc2   : > { %vm295_vm1 = vcmp.eq.f32.partialorder %v288_v0, %v294_v4 }
  0xc3   : > { %v296_v5 = vsel %vm295_vm1, %v948_v3, 8 }
  0xc4   : > { %v297_v6 = vsel %vm291_vm0, %v296_v5, 2147483647 }
  0xc5   : > { %v299_v7 = vshra.s32 %v297_v6, 16  ;;  %v298_v9 = vand.u32 65535, %v297_v6 }
  0xc7   : > { %v301_v8 = vcvt.s32.f32 %v299_v7  ;;  %v300_v11 = vcvt.s32.f32 %v298_v9 }
  0xc9   : > { %302 = vmin.xlane.f32.xlu0 %v301_v8 }
 0x156   : > { %v303_v10 = vpop.xlane.xlu0 %302 }
 0x157   : > { %vm304_vm2 = vcmp.eq.f32.partialorder %v301_v8, %v303_v10  ;;  %v309_v14 = vcvt.f32.s32 %v303_v10 }
 0x158   : > { %v305_v12 = vsel %vm304_vm2, %v300_v11, inf }
 0x159   : > { %306 = vmin.xlane.f32.xlu1 %v305_v12  ;;  %v310_v16 = vshll.u32 %v309_v14, 16 }
 0x1e6   : > { %v307_v15 = vpop.xlane.xlu1 %306 }
 0x1e7   : > { %v308_v17 = vcvt.f32.s32 %v307_v15 }
 0x1e9   : > { %v311_v18 = vadd.s32 %v310_v16, %v308_v17 }
 0x1eb   : > { %vm312_vm3 = vcmp.eq.s32.totalorder %v948_v3, %v311_v18 }
 0x1ec   : > { %v316_v19 = vsel %vm312_vm3, -inf, %v288_v0  ;;  %v656_v40 = vsel %vm312_vm3, 1.0, %v814_v13 }
 0x1ed   : > { %v317_v20 = vsel %vm291_vm0, %v316_v19, -inf  ;;  %v315_v41 = vpack.c.bf16 %v656_v40, %v656_v40 }
 0x1ee   : > { %318 = vmax.xlane.f32.xlu1 %v317_v20 }
 0x27b   : > { %v319_v21 = vpop.xlane.xlu1 %318 }
 0x27c   : > { %vm320_vm6 = vcmp.eq.f32.partialorder %v316_v19, %v319_v21  ;;  %v425_v22 = vsel %vm421_vm4, %v294_v4, %v319_v21 }
 0x27d   : > { %v321_v23 = vsel %vm320_vm6, %v948_v3, 8  ;;  %426 = vst.msk [vmem:[%s270_s10] sm:$0xff] %vm423_vm5, %v425_v22 }
 0x27e   : > { %v322_v24 = vsel %vm291_vm0, %v321_v23, 2147483647 }
 0x27f   : > { %v324_v25 = vshra.s32 %v322_v24, 16  ;;  %v323_v27 = vand.u32 65535, %v322_v24 }
 0x281   : > { %v326_v26 = vcvt.s32.f32 %v324_v25  ;;  %v325_v29 = vcvt.s32.f32 %v323_v27 }
 0x283   : > { %327 = vmin.xlane.f32.xlu0 %v326_v26 }
 0x310   : > { %v328_v28 = vpop.xlane.xlu0 %327 }
 0x311   : > { %vm329_vm7 = vcmp.eq.f32.partialorder %v326_v26, %v328_v28  ;;  %v334_v31 = vcvt.f32.s32 %v328_v28 }
 0x312   : > { %v330_v30 = vsel %vm329_vm7, %v325_v29, inf }
 0x313   : > { %331 = vmin.xlane.f32.xlu1 %v330_v30  ;;  %v335_v33 = vshll.u32 %v334_v31, 16 }
 0x3a0   : > { %v332_v32 = vpop.xlane.xlu1 %331 }
 0x3a1   : > { %v333_v34 = vcvt.f32.s32 %v332_v32 }
 0x3a3   : > { %v336_v35 = vadd.s32 %v335_v33, %v333_v34 }
 0x3a5   : > { %vm337_vm10 = vcmp.eq.s32.totalorder %v948_v3, %v336_v35  ;;  %v422_v36 = vsel %vm421_vm4, %v311_v18, %v336_v35 }
 0x3a6   : > { %424 = vst.msk [vmem:[%s263_s13] sm:$0xff] %vm423_vm5, %v422_v36  ;;  %v657_v37 = vsel %vm337_vm10, 1.0, %v814_v13 }
 0x3a7   : > { %v340_v38 = vpack.c.bf16 %v657_v37, %v657_v37 }
 0x3a9   : > { %348 = vrot.lane.b32.xlu0 %v340_v38, %s816_s14 }
 0x41b   : > { %v349_v43 = vpop.permute.xlu0 %348 }
 0x41c   : > { %v352_v44 = vsel %vm291_vm0, %v315_v41, %v349_v43 }
 0x41d   : > { %v357_v45 = vsel %vm356_vm12, %v352_v44, 0 }
 0x41e   : > { %666 = vmatpush3.bf16.msra.mxu0 %v357_v45 }
 0x421   : > { %668 = vmatmul.mubr.msk.bf16.vlgmr.msra.gmra.mrb[0].mxu0 %vm291_vm0, %v346_v46 }
 0x4f4   : > { %v393_v52 = vpop.f32.mrb[0].mxu0 }
 0x4f5   : > { %v406_v53 = vadd.f32 %v660_v50, %v393_v52  ;;  %v431_v54 = vcombine.high %v393_v52, %v393_v52  ;;  %v669_v55 = vpop.f32.mrb[1].mxu0 }
 0x4f6   : > { %v396_v56 = vpop.f32.mrb[2].mxu0 }
 0x4f7   : > { %v438_v57 = vrot.slane %v431_v54, %v437_v51  ;;  %v670_v58 = vpop.f32.mrb[3].mxu0  ;;  %414 = vrot.lane.b32.xlu1 %v406_v53, %s818_s15  ;;  %v408_v1 = vmul.f32 %v656_v40, %v406_v53 }
 0x4f9   : > { %v439_v59 = vcombine.high %v438_v57, %v438_v57  ;;  %v409_v2 = vsel %vm291_vm0, %v408_v1, 0.0 }
 0x4fb   : > { %v446_v60 = vrot.slane %v439_v59, %v437_v51 }
 0x4fd   : > { %v447_v62 = vcombine.high %v446_v60, %v446_v60 }
 0x4ff   : > { %v449_v63 = vadd.f32 %v447_v62, %v429_v61 }
 0x501   : > { %451 = vst.msk [vmem:[#allocation2] sm:$0x1] %vm286_vm9, %v449_v63 }
 0x508   : > { %v452_v0 = vld [vmem:[#allocation2] sm:$0x1] }
 0x509   : > { %453 = vst.msk [vmem:[%s280_s24] sm:$0x1] %vm286_vm9, %v452_v0 }
 0x51b   : > { %410 = vadd.xlane.f32.xlu1 %v409_v2 }
 0x569   : > { %v415_v3 = vpop.permute.xlu1 %414 }
 0x56a   : > { %v417_v4 = vmul.f32 %v657_v37, %v415_v3 }
 0x56c   : > { %v418_v5 = vsel %vm291_vm0, %v417_v4, 0.0 }
 0x56d   : > { %419 = vadd.xlane.f32.xlu0 %v418_v5 }
 0x5a8   : > { %v411_v6 = vpop.xlane.xlu1 %410 }
 0x5fa   : > { %v420_v7 = vpop.xlane.xlu0 %419 }
 0x5fb   : > { %v427_v8 = vsel %vm421_vm4, %v411_v6, %v420_v7 }
 0x5fc   : > { %428 = vst.msk [vmem:[%s277_s29] sm:$0xff] %vm423_vm5, %v427_v8 }
 0x5fd PF: > { %s18_s20 = sadd.s32 1, %s811_s20   ;;  %s1027_s15 = smov %s795_s16 }
 0x5fe   : > { %p15_p9 = scmp.ge.s32.totalorder %s18_s20, 4   ;;  %s1028_s16 = smov %s799_s17 }
 0x5ff   : > { %s1029_s17 = smov %s893_s27  ;;  %s1030_s18 = smov %s807_s19 }
 0x600   : > { %s1031_s19 = smov %s1033_s22  ;;  %17 = sbr.rel (!%p15_p9) target bundleno = 4 (0x4), region = 104 }
 0x607   :  { %531 = vsyncpa [#allocation4], 1 }
 0x608   :  { %533 = vsyncpa [#allocation4 + $0x1], 1 }

// kernel: _lambda_.3
= control target key start
LH: loop header
LB: loop body
LE: loop exit
PB: predicated region body
PF: predicated region fallthrough
CT: control target
= control target key end

     0   :  { %s673_s18 = smov 0   ;;  %s675_s19 = smov 0   ;;  %s732_s0 = inlined_call_operand.vmem [shape: s32[2,8,2], index: 0, kind: input, shape index: {}]   ;;  %s733_s1 = inlined_call_operand.vmem [shape: f32[2,8,2], index: 1, kind: input, shape index: {}]   ;;  %s734_s2 = inlined_call_operand.vmem [shape: f32[2,8,2], index: 2, kind: input, shape index: {}]   ;;  %s735_s3 = inlined_call_operand.vmem [shape: f32[2,1,16], index: 3, kind: input, shape index: {}]   ;;  %s736_s4 = inlined_call_operand.vmem [shape: f32[2,8,32], index: 4, kind: output, shape index: {0}]   ;;  %s737_s5 = inlined_call_operand.vmem [shape: s8[2,8,32], index: 5, kind: output, shape index: {1}]  }
   0x1   :  { %s677_s20 = smov 0  }
   0x2 LB: > { %s28_s21 = sadd.s32 1, %s634_s19  ;;  %p571_p0 = scmp.ge.s32.totalorder %s638_s20, 1  ;;  %s638_s20 = sphi %s677_s20, %s16_s20   ;;  %s634_s19 = sphi %s675_s19, %s739_s19   ;;  %s630_s18 = sphi %s673_s18, %s738_s18  }
   0x3   : > { %p30_p1 = scmp.ge.s32.totalorder %s28_s21, 2  ;;  %p246_p2 = scmp.lt.s32.totalorder %s638_s20, 3 }
   0x5   : > { %s741_s21 = smov (%p30_p1, %s28_s21), 0  ;;  %p247_p3 = pnand %p571_p0, %p246_p2 }
   0x6   : > { %p302_p4 = scmp.lt.s32.totalorder (!%p247_p3), %s630_s18, 1  ;;  %v640_v0 = vmov (!%p247_p3), 0   ;;  %s641_s29 = smov (!%p247_p3), 120   ;;  %v642_v3 = vmov (!%p247_p3), 1   ;;  %v345_v4 = vlaneseq (!%p247_p3)  ;;  %vm359_vm0 = vcmask (!%p247_p3), 64512  }
   0x7   : > { %250 = sbr.rel (%p247_p3) target bundleno = 440 (0x1b8), region = 36  ;;  %612 = vset.pattern.permute.xlu0 (!%p247_p3), %v640_v0  ;;  %614 = vset.pattern.permute.xlu1 (!%p247_p3), %v640_v0  ;;  %vm411_vm8 = vcmask (!%p247_p3), 254976   ;;  %vm406_vm10 = vcmask (!%p247_p3), 261120  }
   0x8   : > { %v346_v5 = vand.u32 (!%p247_p3), 127, %v345_v4 }
   0xe   : > { %s743_s18 = smov (!%p302_p4, %s630_s18), 1 }
   0xf   : > { %s696_s22 = sshll.u32 %s743_s18, 3  ;;  %s325_s25 = scalar_lea.vmem %s735_s3, %s743_s18 }
  0x10   : > { %s308_s28 = scalar_lea.vmem %s732_s0, %s696_s22  ;;  %v577_v1 = vld [vmem:[%s325_s25] ss:$0 sm:$0xff]  ;;  %s322_s7 = scalar_lea.vmem %s734_s2, %s696_s22 }
  0x11   : > { %v342_v2 = vld [vmem:[%s308_s28] sm:$0xff]  ;;  %384 = vrot.lane.b32.xlu1 %v577_v1, %s641_s29  ;;  %s315_s10 = scalar_lea.vmem %s733_s1, %s696_s22  ;;  %s576_s11 = sshll.u32 %s743_s18, 1 }
  0x12   : > { %349 = vperm.xlu0 %612, %v342_v2   ;;  %v344_v13 = vld [vmem:[%s322_s7] sm:$0xff]  ;;  %v366_v17 = vmul.u32 4, %v342_v2  ;;  %s339_s14 = scalar_lea.vmem %s737_s5, %s576_s11  ;;  %s332_s17 = scalar_lea.vmem %s736_s4, %s696_s22 }
  0x13   : > { %v578_v14 = vadd.f32 -1.0, %v344_v13  ;;  %v343_v26 = vld [vmem:[%s315_s10] sm:$0xff] }
  0x16   : > { %613 = vset.pattern.permute.xlu0 %v642_v3 }
  0x17   : > { %381 = vperm.xlu0 %613, %v342_v2  }
  0x83   : > { %v385_v9 = vpop.permute.xlu1 %384 }
  0x91   : > { %v350_v6 = vpop.permute.xlu0 %349 }
  0x92   : > { %vm351_vm1 = vcmp.eq.s32.totalorder %v346_v5, %v350_v6 }
  0x93   : > { %v358_v7 = vsel %vm351_vm1, %v577_v1, 0.0 }
  0x94   : > { %v360_v8 = vsel %vm359_vm0, %v358_v7, 0.0 }
  0x95   : > { %361 = vadd.xlane.f32.xlu1 %v360_v8 }
  0x96   : > { %v382_v10 = vpop.permute.xlu0 %381 }
  0x97   : > { %vm383_vm2 = vcmp.eq.s32.totalorder %v346_v5, %v382_v10 }
  0x98   : > { %v387_v11 = vsel %vm383_vm2, %v385_v9, 0.0 }
  0x99   : > { %v388_v12 = vsel %vm359_vm0, %v387_v11, 0.0 }
  0x9a   : > { %389 = vadd.xlane.f32.xlu0 %v388_v12 }
 0x122   : > { %v362_v15 = vpop.xlane.xlu1 %361 }
 0x123   : > { %v364_v16 = vadd.f32 %v578_v14, %v362_v15 }
 0x125   : > { %v581_v18 = vtrunc.f32 %v364_v16  ;;  %vm365_vm3 = vcmp.lt.f32.partialorder %v364_v16, 4.0 }
 0x127   : > { %v582_v19 = vcvt.f32.s32 %v581_v18  ;;  %v390_v20 = vpop.xlane.xlu0 %389 }
 0x128   : > { %v391_v21 = vadd.f32 %v578_v14, %v390_v20 }
 0x129   : > { %v368_v22 = vadd.s32 %v582_v19, %v366_v17 }
 0x12a   : > { %v583_v23 = vtrunc.f32 %v391_v21  ;;  %vm392_vm4 = vcmp.lt.f32.partialorder %v391_v21, 4.0 }
 0x12b   : > { %v369_v24 = vsel %vm365_vm3, %v368_v22, 4294967295 }
 0x12c   : > { %v584_v25 = vcvt.f32.s32 %v583_v23  ;;  %371 = vperm.xlu1 %614, %v369_v24  }
 0x12e   : > { %v394_v27 = vadd.s32 %v584_v25, %v366_v17 }
 0x130   : > { %376 = vperm.xlu1 %614, %v343_v26   ;;  %v395_v28 = vsel %vm392_vm4, %v394_v27, 4294967295 }
 0x131   : > { %397 = vperm.xlu0 %613, %v395_v28  }
 0x134   : > { %615 = vset.pattern.permute.xlu1 %v642_v3 }
 0x135   : > { %401 = vperm.xlu1 %615, %v343_v26  }
 0x1ab   : > { %v372_v29 = vpop.permute.xlu1 %371 }
 0x1ac   : > { %vm373_vm5 = vcmp.eq.s32.totalorder %v346_v5, %v372_v29 }
 0x1af   : > { %v377_v30 = vpop.permute.xlu1 %376 }
 0x1b0   : > { %v398_v31 = vpop.permute.xlu0 %397  ;;  %v379_v32 = vsel %vm373_vm5, %v377_v30, 0.0 }
 0x1b1   : > { %vm399_vm6 = vcmp.eq.s32.totalorder %v346_v5, %v398_v31 }
 0x1b2   : > { %vm405_vm7 = vmor %vm373_vm5, %vm399_vm6 }
 0x1b3   : > { %vm408_vm9 = vmpackc.low %vm405_vm7, %vm405_vm7 }
 0x1b4   : > { %vm409_vm11 = vmpackc.even %vm408_vm9, %vm408_vm9  ;;  %v402_v33 = vpop.permute.xlu1 %401 }
 0x1b5   : > { %v410_v34 = vsel %vm409_vm11, 16843009, %v640_v0  ;;  %v404_v35 = vsel %vm399_vm6, %v402_v33, %v379_v32 }
 0x1b6   : > { %412 = vst.msk [vmem:[%s339_s14] sm:$0x3] %vm411_vm8, %v410_v34 }
 0x1b7   : > { %407 = vst.msk [vmem:[%s332_s17] sm:$0xff] %vm406_vm10, %v404_v35 }
 0x1b8 PF: > { %s16_s20 = sadd.s32 1, %s638_s20   ;;  %s738_s18 = smov %s634_s19 }
 0x1b9   : > { %p13_p5 = scmp.ge.s32.totalorder %s16_s20, 4   ;;  %s739_s19 = smov %s741_s21 }
 0x1bb   :  { %15 = sbr.rel (!%p13_p5) target bundleno = 2 (0x2), region = 87 }

</bundles_post_ra>
